<compile_context>
chip_gen: v6e
topology: v6e:2x2x1
jax: 0.10.0
libtpu: 0.0.40
codegen_flags: <defaults>
</compile_context>

<pallas_src>
import jax
import jax.numpy as jnp
from jax.experimental import pallas as pl
from jax.experimental.pallas import tpu as pltpu

HIDDEN = 24
LANE = 128


def _round_up(x, m):
    return (x + m - 1) // m * m


def dqn_kernel(x_ref, w1_ref, b1_ref, w2_ref, b2_ref, w3_ref, b3_ref, o_ref):
    w_dtype = w1_ref.dtype  # bf16 by default (see prepare_params)

    # fc1 + ReLU: bf16 MXU dot, f32 accumulate, f32 bias-add/ReLU on the VPU.
    x = x_ref[...].astype(w_dtype)
    h1 = jnp.dot(x, w1_ref[...], preferred_element_type=jnp.float32)
    h1 = jnp.maximum(h1 + b1_ref[...], 0.0)

    # fc2 + ReLU
    h2 = jnp.dot(h1.astype(w_dtype), w2_ref[...],
                 preferred_element_type=jnp.float32)
    h2 = jnp.maximum(h2 + b2_ref[...], 0.0)

    # fc3 (no activation) — output is lane-dense (padded to 128 lanes) and
    # stored in o_ref.dtype (bf16 by default -> half the HBM writeback).
    out = jnp.dot(h2.astype(w_dtype), w3_ref[...],
                  preferred_element_type=jnp.float32) + b3_ref[...]
    o_ref[...] = out.astype(o_ref.dtype)


def prepare_params(params, weight_dtype=jnp.bfloat16):
    """One-time parameter prep.

    * Pads W3/b3 columns to a full 128-lane width (zeros, sliced off later).
    * Casts weight matrices to `weight_dtype` (bf16 by default) so the MXU
      runs native bf16 passes; biases stay f32 (added in f32 on the VPU).

    Returns (padded_params, action_size).
    """
    W3, b3 = params["W3"], params["b3"]
    action_size = W3.shape[1]
    n_pad = _round_up(action_size, LANE)
    W3p = jnp.pad(W3, ((0, 0), (0, n_pad - action_size)))
    b3p = jnp.pad(b3, ((0, 0), (0, n_pad - action_size)))
    padded = {
        "W1": params["W1"].astype(weight_dtype),
        "b1": params["b1"].astype(jnp.float32),
        "W2": params["W2"].astype(weight_dtype),
        "b2": params["b2"].astype(jnp.float32),
        "W3": W3p.astype(weight_dtype),
        "b3": b3p.astype(jnp.float32),
    }
    return padded, action_size


def dqn_forward(x, padded_params, action_size, *, max_tile=2048,
                out_dtype=jnp.bfloat16):
    """x: [B, state_size] float32. padded_params from prepare_params().

    Returns float32 [B, action_size] Q-values.
    """
    p = padded_params
    B, state_size = x.shape
    n_pad = p["W3"].shape[1]
    x = x.astype(jnp.float32)

    # Batch tile: multiple of the output sublane packing (16 rows for bf16,
    # 8 for f32), capped at max_tile rows. Bigger tiles amortize the ~0.35 us
    # per-grid-step overhead; default 2048 keeps per-step VMEM at a few MiB.
    out_itemsize = jnp.dtype(out_dtype).itemsize
    sub = 16 if out_itemsize < 4 else 8
    TB = min(_round_up(max_tile, sub), _round_up(B, sub))
    B_pad = _round_up(B, TB)
    if B_pad != B:
        x = jnp.pad(x, ((0, B_pad - B), (0, 0)))

    grid = (B_pad // TB,)

    def resident(shape):
        # Same block every grid step -> weights/biases stay resident in VMEM
        # (DMA'd once, not per step).
        return pl.BlockSpec(shape, lambda i: (0, 0))

    # Advisory cost: tiny FLOPs, memory-/latency-bound.
    param_bytes = sum(int(v.size) * v.dtype.itemsize for v in p.values())
    flops = 2 * B_pad * (state_size * HIDDEN + HIDDEN * HIDDEN + HIDDEN * n_pad)
    bytes_accessed = (B_pad * state_size * x.dtype.itemsize
                      + B_pad * n_pad * out_itemsize + param_bytes)
    cost = pl.CostEstimate(flops=flops, transcendentals=0,
                           bytes_accessed=bytes_accessed)

    # Scoped-VMEM estimate: double-buffered x + out tiles, resident weights,
    # plus slack for the lane-padded f32 h1/h2/out temporaries. Only raise the
    # limit when a caller requests very large tiles (v5e default is 16 MiB).
    vmem_est = (2 * TB * state_size * 4
                + 2 * TB * n_pad * out_itemsize
                + param_bytes
                + 6 * TB * LANE * 4)
    cp_kwargs = dict(dimension_semantics=("parallel",))
    if vmem_est > 12 * 1024 * 1024:
        cp_kwargs["vmem_limit_bytes"] = min(2 * vmem_est, 48 * 1024 * 1024)

    out = pl.pallas_call(
        dqn_kernel,
        out_shape=jax.ShapeDtypeStruct((B_pad, n_pad), out_dtype),
        grid=grid,
        in_specs=[
            pl.BlockSpec((TB, state_size), lambda i: (i, 0)),   # x: batch-tiled
            resident(p["W1"].shape),
            resident(p["b1"].shape),
            resident(p["W2"].shape),
            resident(p["b2"].shape),
            resident(p["W3"].shape),
            resident(p["b3"].shape),
        ],
        out_specs=pl.BlockSpec((TB, n_pad), lambda i: (i, 0)),
        compiler_params=pltpu.CompilerParams(**cp_kwargs),
        cost_estimate=cost,
    )(x, p["W1"], p["b1"], p["W2"], p["b2"], p["W3"], p["b3"])

    # Slice off padded rows/columns; return f32 Q-values (module semantics).
    return out[:B, :action_size].astype(jnp.float32)


def init_params(key, state_size, action_size, hidden=HIDDEN):
    """Deterministic synthetic parameters (shapes match the PyTorch module)."""
    ks = jax.random.split(key, 6)

    def lin(kw, kb, fan_in, fan_out):
        # Uniform(-1/sqrt(fan_in), 1/sqrt(fan_in)) like torch default init.
        bound = 1.0 / jnp.sqrt(jnp.float32(fan_in))
        W = jax.random.uniform(kw, (fan_in, fan_out), jnp.float32, -bound, bound)
        b = jax.random.uniform(kb, (1, fan_out), jnp.float32, -bound, bound)
        return W, b

    W1, b1 = lin(ks[0], ks[1], state_size, hidden)
    W2, b2 = lin(ks[2], ks[3], hidden, hidden)
    W3, b3 = lin(ks[4], ks[5], hidden, action_size)
    return {"W1": W1, "b1": b1, "W2": W2, "b2": b2, "W3": W3, "b3": b3}


def dqn_ref(x, p):
    h1 = jnp.maximum(x @ p["W1"] + p["b1"], 0.0)
    h2 = jnp.maximum(h1 @ p["W2"] + p["b2"], 0.0)
    return h2 @ p["W3"] + p["b3"]


if __name__ == "__main__":
    key = jax.random.PRNGKey(0)
    k_x, k_p, k_x2 = jax.random.split(key, 3)

    # LunarLander-v2: state_size=8, action_size=4; small batch.
    B, state_size, action_size = 2, 8, 4
    params = init_params(k_p, state_size, action_size)
    padded_params, n_act = prepare_params(params)

    x = jax.random.normal(k_x, (B, state_size), jnp.float32)
    out = dqn_forward(x, padded_params, n_act)
    out = jax.block_until_ready(out)
    ref = dqn_ref(x, params)
    assert out.shape == (B, action_size)
    # bf16 weights / bf16 output stream -> loosened tolerance vs f32 reference.
    assert jnp.allclose(out, ref, atol=5e-2, rtol=5e-2)

    # Exercise the batch-tiled path (padding + multiple grid steps).
    B2 = 300
    x2 = jax.random.normal(k_x2, (B2, state_size), jnp.float32)
    out2 = dqn_forward(x2, padded_params, n_act, max_tile=128)
    out2 = jax.block_until_ready(out2)
    ref2 = dqn_ref(x2, params)
    assert out2.shape == (B2, action_size)
    assert jnp.allclose(out2, ref2, atol=5e-2, rtol=5e-2)

    print("KERNEL_OK")
</pallas_src>

<mosaic_0001>
module attributes {stable_mosaic.version = 11 : i64} {
  func.func @dqn_kernel(%arg0: i32, %arg1: memref<16x8xf32, #tpu.memory_space<vmem>>, %arg2: memref<8x24xbf16, #tpu.memory_space<vmem>>, %arg3: memref<1x24xf32, #tpu.memory_space<vmem>>, %arg4: memref<24x24xbf16, #tpu.memory_space<vmem>>, %arg5: memref<1x24xf32, #tpu.memory_space<vmem>>, %arg6: memref<24x128xbf16, #tpu.memory_space<vmem>>, %arg7: memref<1x128xf32, #tpu.memory_space<vmem>>, %arg8: memref<16x128xbf16, #tpu.memory_space<vmem>>) attributes {dimension_semantics = [#tpu.dimension_semantics<parallel>], iteration_bounds = array<i64: 1>, scalar_prefetch = 0 : i64, scratch_operands = 0 : i64, tpu.core_type = #tpu.core_type<tc>, window_params = [{transform_indices = @transform_0, window_bounds = array<i64: 16, 8>}, {pipeline_mode = #tpu.pipeline_mode<synchronous>, transform_indices = @transform_1, window_bounds = array<i64: 8, 24>}, {pipeline_mode = #tpu.pipeline_mode<synchronous>, transform_indices = @transform_2, window_bounds = array<i64: 1, 24>}, {pipeline_mode = #tpu.pipeline_mode<synchronous>, transform_indices = @transform_3, window_bounds = array<i64: 24, 24>}, {pipeline_mode = #tpu.pipeline_mode<synchronous>, transform_indices = @transform_4, window_bounds = array<i64: 1, 24>}, {pipeline_mode = #tpu.pipeline_mode<synchronous>, transform_indices = @transform_5, window_bounds = array<i64: 24, 128>}, {pipeline_mode = #tpu.pipeline_mode<synchronous>, transform_indices = @transform_6, window_bounds = array<i64: 1, 128>}, {transform_indices = @transform_7, window_bounds = array<i64: 16, 128>}]} {
    %c0 = arith.constant 0 : index
    %c0_0 = arith.constant 0 : index
    %0 = vector.load %arg1[%c0, %c0_0] : memref<16x8xf32, #tpu.memory_space<vmem>>, vector<16x8xf32>
    %1 = arith.truncf %0 : vector<16x8xf32> to vector<16x8xbf16>
    %c0_1 = arith.constant 0 : index
    %c0_2 = arith.constant 0 : index
    %2 = vector.load %arg2[%c0_1, %c0_2] : memref<8x24xbf16, #tpu.memory_space<vmem>>, vector<8x24xbf16>
    %cst = arith.constant dense<0.000000e+00> : vector<16x24xf32>
    %3 = tpu.matmul %1, %2, %cst {dimension_numbers = #tpu.dot_dimension_numbers<[1], [0], [0], [1], [0, 0, 1, 1], [], []>} : vector<16x8xbf16>, vector<8x24xbf16>, vector<16x24xf32> -> vector<16x24xf32>
    %c0_3 = arith.constant 0 : index
    %c0_4 = arith.constant 0 : index
    %4 = vector.load %arg3[%c0_3, %c0_4] : memref<1x24xf32, #tpu.memory_space<vmem>>, vector<1x24xf32>
    %5 = vector.broadcast %4 : vector<1x24xf32> to vector<16x24xf32>
    %6 = arith.addf %3, %5 : vector<16x24xf32>
    %cst_5 = arith.constant 0.000000e+00 : f32
    %7 = vector.broadcast %cst_5 : f32 to vector<16x24xf32>
    %8 = arith.maximumf %6, %7 : vector<16x24xf32>
    %9 = arith.truncf %8 : vector<16x24xf32> to vector<16x24xbf16>
    %c0_6 = arith.constant 0 : index
    %c0_7 = arith.constant 0 : index
    %10 = vector.load %arg4[%c0_6, %c0_7] : memref<24x24xbf16, #tpu.memory_space<vmem>>, vector<24x24xbf16>
    %cst_8 = arith.constant dense<0.000000e+00> : vector<16x24xf32>
    %11 = tpu.matmul %9, %10, %cst_8 {dimension_numbers = #tpu.dot_dimension_numbers<[1], [0], [0], [1], [0, 0, 1, 1], [], []>} : vector<16x24xbf16>, vector<24x24xbf16>, vector<16x24xf32> -> vector<16x24xf32>
    %c0_9 = arith.constant 0 : index
    %c0_10 = arith.constant 0 : index
    %12 = vector.load %arg5[%c0_9, %c0_10] : memref<1x24xf32, #tpu.memory_space<vmem>>, vector<1x24xf32>
    %13 = vector.broadcast %12 : vector<1x24xf32> to vector<16x24xf32>
    %14 = arith.addf %11, %13 : vector<16x24xf32>
    %cst_11 = arith.constant 0.000000e+00 : f32
    %15 = vector.broadcast %cst_11 : f32 to vector<16x24xf32>
    %16 = arith.maximumf %14, %15 : vector<16x24xf32>
    %17 = arith.truncf %16 : vector<16x24xf32> to vector<16x24xbf16>
    %c0_12 = arith.constant 0 : index
    %c0_13 = arith.constant 0 : index
    %18 = vector.load %arg6[%c0_12, %c0_13] : memref<24x128xbf16, #tpu.memory_space<vmem>>, vector<24x128xbf16>
    %cst_14 = arith.constant dense<0.000000e+00> : vector<16x128xf32>
    %19 = tpu.matmul %17, %18, %cst_14 {dimension_numbers = #tpu.dot_dimension_numbers<[1], [0], [0], [1], [0, 0, 1, 1], [], []>} : vector<16x24xbf16>, vector<24x128xbf16>, vector<16x128xf32> -> vector<16x128xf32>
    %c0_15 = arith.constant 0 : index
    %c0_16 = arith.constant 0 : index
    %20 = vector.load %arg7[%c0_15, %c0_16] : memref<1x128xf32, #tpu.memory_space<vmem>>, vector<1x128xf32>
    %21 = vector.broadcast %20 : vector<1x128xf32> to vector<16x128xf32>
    %22 = arith.addf %19, %21 : vector<16x128xf32>
    %23 = arith.truncf %22 : vector<16x128xf32> to vector<16x128xbf16>
    %c0_17 = arith.constant 0 : index
    %c0_18 = arith.constant 0 : index
    %24 = vector.load %arg8[%c0_17, %c0_18] : memref<16x128xbf16, #tpu.memory_space<vmem>>, vector<16x128xbf16>
    tpu.vector_store %arg8[%c0_17, %c0_18], %23 {strides = array<i32>} : memref<16x128xbf16, #tpu.memory_space<vmem>>, vector<16x128xbf16>,
    return
  }
  func.func @transform_0(%arg0: i32) -> (i32, i32) {
    %c0_i32 = arith.constant 0 : i32
    %c0_i32_0 = arith.constant 0 : i32
    return %arg0, %c0_i32 : i32, i32
  }
  func.func @transform_1(%arg0: i32) -> (i32, i32) {
    %c0_i32 = arith.constant 0 : i32
    %c0_i32_0 = arith.constant 0 : i32
    %c0_i32_1 = arith.constant 0 : i32
    return %c0_i32, %c0_i32_0 : i32, i32
  }
  func.func @transform_2(%arg0: i32) -> (i32, i32) {
    %c0_i32 = arith.constant 0 : i32
    %c0_i32_0 = arith.constant 0 : i32
    %c0_i32_1 = arith.constant 0 : i32
    return %c0_i32, %c0_i32_0 : i32, i32
  }
  func.func @transform_3(%arg0: i32) -> (i32, i32) {
    %c0_i32 = arith.constant 0 : i32
    %c0_i32_0 = arith.constant 0 : i32
    %c0_i32_1 = arith.constant 0 : i32
    return %c0_i32, %c0_i32_0 : i32, i32
  }
  func.func @transform_4(%arg0: i32) -> (i32, i32) {
    %c0_i32 = arith.constant 0 : i32
    %c0_i32_0 = arith.constant 0 : i32
    %c0_i32_1 = arith.constant 0 : i32
    return %c0_i32, %c0_i32_0 : i32, i32
  }
  func.func @transform_5(%arg0: i32) -> (i32, i32) {
    %c0_i32 = arith.constant 0 : i32
    %c0_i32_0 = arith.constant 0 : i32
    %c0_i32_1 = arith.constant 0 : i32
    return %c0_i32, %c0_i32_0 : i32, i32
  }
  func.func @transform_6(%arg0: i32) -> (i32, i32) {
    %c0_i32 = arith.constant 0 : i32
    %c0_i32_0 = arith.constant 0 : i32
    %c0_i32_1 = arith.constant 0 : i32
    return %c0_i32, %c0_i32_0 : i32, i32
  }
  func.func @transform_7(%arg0: i32) -> (i32, i32) {
    %c0_i32 = arith.constant 0 : i32
    %c0_i32_0 = arith.constant 0 : i32
    return %arg0, %c0_i32 : i32, i32
  }
}

</mosaic_0001>

<bundles_post_ra>
// kernel: tpu_custom_call.1
= control target key start
LH: loop header
LB: loop body
LE: loop exit
PB: predicated region body
PF: predicated region fallthrough
CT: control target
= control target key end

     0   :  { %12 = vsyncpa [#allocation3], 0  ;;  %s453_s0 = inlined_call_operand.vmem [shape: f32[16,8], index: 0, kind: input, shape index: {}]   ;;  %s454_s1 = inlined_call_operand.hbm [shape: bf16[8,24], index: 1, kind: input, shape index: {}]   ;;  %s455_s2 = inlined_call_operand.vmem [shape: f32[1,24], index: 2, kind: input, shape index: {}]   ;;  %s456_s3 = inlined_call_operand.vmem [shape: bf16[24,24], index: 3, kind: input, shape index: {}]   ;;  %s457_s4 = inlined_call_operand.vmem [shape: f32[1,24], index: 4, kind: input, shape index: {}]   ;;  %s458_s5 = inlined_call_operand.vmem [shape: bf16[24,128], index: 5, kind: input, shape index: {}]   ;;  %s459_s6 = inlined_call_operand.vmem [shape: f32[1,128], index: 6, kind: input, shape index: {}]   ;;  %s460_s7 = inlined_call_operand.hbm [shape: bf16[16,128], index: 7, kind: output, shape index: {}]  }
   0x1   :  { %13 = vsyncpa [#allocation4], 0  ;;  %s369_s24 = smov [#allocation2]  }
   0x2   :  { %s22_s25 = sshll.u32 %s369_s24, 4  ;;  %s23_s25 = int_to_ptr.vmem [resolvable:$true] %s22_s25 }
   0x3   :  { %s333_s26 = scalar_lea.vmem %s23_s25, 64  ;;  %p338_p1 = scmp.lt.s32.totalorder %s23_s25, %s23_s25 }
   0x4   :  { %p334_p0 = scmp.ne.s32.totalorder %s23_s25, %s333_s26  ;;  %p339_p2 = scmp.lt.s32.totalorder %s333_s26, %s333_s26 }
   0x6   :  { %p340_p3 = por %p339_p2, %p338_p1 }
   0x8   :  { %p341_p4 = pnand %p340_p3, %p334_p0 }
   0xa   :  { %344 = shalt.err (!%p341_p4)
}
   0xb   :  { %25 = dma.hbm_to_vmem [thread:$0]  %s454_s1, 64, %s23_s25, [#allocation3]  }
   0xc   :  { %365 = dma.done.wait [#allocation3], 64  }
   0xd   :  { %366 = vsyncadd [#allocation3], 4294967232  ;;  %v370_v0 = vmov 0.0   ;;  %vm371_vm0 = vmmov 0   ;;  %vm55_vm1 = vcmask 1043456   ;;  %v40_v2 = vld [vmem:[%s453_s0] sm:$0xff] }
   0xe   :  { %293 = vmatprep.subr.bf16.mxu0 %v370_v0  ;;  %295 = vmatprep.mubr.msk.bf16.mxu0 %vm371_vm0, %v370_v0  ;;  %v43_v1 = vld [vmem:[#allocation2] sm:$0xf]  ;;  %v41_v3 = vld [vmem:[%s453_s0 + $0x8] sm:$0xff]  ;;  %vm51_vm2 = vcmask 64512   ;;  %vm122_vm3 = vcmask 195584  }
   0xf   :  { %299 = vmatprep.subr.bf16.mxu1 %v370_v0  ;;  %303 = vmatprep.mubr.msk.bf16.mxu1 %vm371_vm0, %v370_v0  ;;  %v57_v4 = vsel %vm55_vm1, %v43_v1, 0  ;;  %v42_v5 = vpack.c.bf16 %v41_v3, %v40_v2  ;;  %v321_v6 = vld [vmem:[%s456_s3 + $0x8] ss:$0 sps:$4 sm:$0xff]   ;;  %v322_v8 = vld [vmem:[%s456_s3] sm:$0xff]  }
  0x10   :  { %294 = vmatpush3.bf16.msra.mxu0 %v57_v4  ;;  %v127_v7 = vsel %vm55_vm1, %v321_v6, 0  ;;  %v266_v9 = vld [vmem:[%s455_s2] ss:$0 sm:$0xff]  ;;  %v323_v19 = vld [vmem:[%s458_s5 + $0x8] ss:$0 sps:$4 sm:$0xff]  }
  0x11   :  { %307 = vmatprep.subr.bf16.mxu0 %v370_v0  ;;  %300 = vmatpush3.bf16.msra.mxu1 %v127_v7  ;;  %v196_v20 = vsel %vm55_vm1, %v323_v19, 0  ;;  %v324_v21 = vld [vmem:[%s458_s5] sm:$0xff]   ;;  %s372_s5 = smov [#allocation5]  }
  0x12   :  { %301 = vmatprep.subr.bf16.mxu1 %v370_v0  ;;  %v268_v22 = vld [vmem:[%s457_s4] ss:$0 sm:$0xff]  ;;  %s254_s20 = sshll.u32 %s372_s5, 4  ;;  %s255_s20 = int_to_ptr.vmem [resolvable:$true] %s254_s20 }
  0x13   :  { %296 = vmatmul.mubr.msk.bf16.vlgmr.msra.gmra.mxu0 %vm51_vm2, %v42_v5  ;;  %v272_v33 = vld [vmem:[%s459_s6] ss:$0 sm:$0xff]  ;;  %s345_s4 = scalar_lea.vmem %s255_s20, 128  ;;  %p350_p6 = scmp.lt.s32.totalorder %s255_s20, %s255_s20 }
  0x14   :  { %311 = vmatprep.mubr.msk.bf16.mxu0 %vm371_vm0, %v370_v0  ;;  %308 = vmatpush3.bf16.msra.mxu0 %v196_v20  ;;  %p346_p5 = scmp.ne.s32.totalorder %s255_s20, %s345_s4  ;;  %p351_p7 = scmp.lt.s32.totalorder %s345_s4, %s345_s4 }
  0x15   :  { %302 = vmatpush3.bf16.msra.mxu1 %v322_v8  ;;  %309 = vmatprep.subr.bf16.mxu0 %v370_v0 }
  0x16   :  { %p352_p8 = por %p351_p7, %p350_p6 }
  0x18   :  { %310 = vmatpush3.bf16.msra.mxu0 %v324_v21  ;;  %p353_p9 = pnand %p352_p8, %p346_p5 }
  0xd3   :  { %v93_v10 = vpop.f32.mrf.mxu0 }
  0xd4   :  { %v94_v12 = vadd.f32 %v266_v9, %v93_v10 }
  0xd5   :  { %v297_v11 = vpop.f32.mrf.mxu0 }
  0xd6   :  { %v100_v16 = vmax.f32 %v94_v12, 0.0 }
  0xd7   :  { %v96_v13 = vpop.f32.mrf.mxu0 }
  0xd8   :  { %v97_v14 = vadd.f32 %v266_v9, %v96_v13 }
  0xd9   :  { %v298_v15 = vpop.f32.mrf.mxu0 }
  0xda   :  { %v101_v17 = vmax.f32 %v97_v14, 0.0 }
  0xdc   :  { %v102_v18 = vpack.c.bf16 %v101_v17, %v100_v16 }
  0xde   :  { %304 = vmatmul.mubr.msk.bf16.vlgmr.msra.gmra.mxu1 %vm122_vm3, %v102_v18 }
 0x19e   :  { %v163_v23 = vpop.f32.mrf.mxu1 }
 0x19f   :  { %v164_v25 = vadd.f32 %v268_v22, %v163_v23 }
 0x1a0   :  { %v305_v24 = vpop.f32.mrf.mxu1 }
 0x1a1   :  { %v170_v29 = vmax.f32 %v164_v25, 0.0 }
 0x1a2   :  { %v166_v26 = vpop.f32.mrf.mxu1 }
 0x1a3   :  { %v167_v27 = vadd.f32 %v268_v22, %v166_v26 }
 0x1a4   :  { %v306_v28 = vpop.f32.mrf.mxu1 }
 0x1a5   :  { %v171_v30 = vmax.f32 %v167_v27, 0.0 }
 0x1a7   :  { %v172_v31 = vpack.c.bf16 %v171_v30, %v170_v29 }
 0x1a9   :  { %312 = vmatmul.mubr.msk.bf16.vlgmr.msra.gmra.mxu0 %vm122_vm3, %v172_v31 }
 0x269   :  { %v232_v32 = vpop.f32.mrf.mxu0 }
 0x26a   :  { %v233_v36 = vadd.f32 %v272_v33, %v232_v32 }
 0x26b   :  { %v313_v34 = vpop.f32.mrf.mxu0 }
 0x26d   :  { %v235_v35 = vpop.f32.mrf.mxu0 }
 0x26e   :  { %v236_v37 = vadd.f32 %v272_v33, %v235_v35 }
 0x26f   :  { %v314_v38 = vpop.f32.mrf.mxu0 }
 0x270   :  { %v283_v39 = vpack.c.bf16 %v236_v37, %v233_v36 }
 0x272   :  { %284 = vst [vmem:[#allocation5] sm:$0xff] %v283_v39  }
 0x273   :  { %356 = shalt.err (!%p353_p9)
}
 0x274   :  { %s373_s21 = smov 64   ;;  %s374_s22 = smov 4  }
 0x275   :  { %260 = dma.vmem_to_hbm [thread:$0]  %s255_s20, 128, %s460_s7, [#allocation4], %s373_s21, %s373_s21, %s374_s22  }
 0x276   :  { %367 = dma.done.wait [#allocation4], 128  }
 0x277   :  { %368 = vsyncadd [#allocation4], 4294967168 }
 0x278   :  { %264 = vsyncpa [#allocation3], 1 }
 0x279   :  { %265 = vsyncpa [#allocation4], 1 }

</bundles_post_ra>
